<compile_context>
chip_gen: v7x
topology: tpu7x:2x2x1
jax: 0.10.0
libtpu: 0.0.40
codegen_flags: <defaults>
</compile_context>

<pallas_src>
import functools

import jax
import jax.numpy as jnp
from jax.experimental import pallas as pl
from jax.experimental.pallas import tpu as pltpu

_NUM_SPLITS = 2   # leading "parallel" grid axis (v7x has 2 TCs; harmless on v5e/v6e)
_LANE = 128


def _edge_loss_kernel(n_ref, scores_ref, labels_ref, masks_ref,
                      osum_ref, ocnt_ref, sum_acc, cnt_acc):
    c = pl.program_id(0)          # split index       (parallel axis)
    j = pl.program_id(1)          # row-block index   (arbitrary / reduction axis)
    steps = pl.num_programs(1)

    @pl.when(j == 0)
    def _():
        sum_acc[...] = jnp.zeros_like(sum_acc)
        cnt_acc[...] = jnp.zeros_like(cnt_acc)

    s = scores_ref[...].astype(jnp.float32)        # (C, T)  promote on the tile only
    lab = labels_ref[...]                          # (1, T)  int32
    msk = masks_ref[...].astype(jnp.float32)       # (1, T)

    tile = s.shape[1]
    # Un-clamped global row index of each lane; rows >= n are tail padding /
    # duplicated-block lanes and get masked out (no jnp.pad needed).
    block = c * steps + j
    col = block * tile + jax.lax.broadcasted_iota(jnp.int32, (1, tile), 1)
    valid = col < n_ref[0]

    # Numerically-stable logsumexp over the class (sublane) axis.
    m = jnp.max(s, axis=0, keepdims=True)                               # (1, T)
    lse = m + jnp.log(jnp.sum(jnp.exp(s - m), axis=0, keepdims=True))   # (1, T)

    # Score at the label index via one-hot compare (no dynamic gather).
    cls = jax.lax.broadcasted_iota(jnp.int32, s.shape, 0)               # (C, T)
    picked = jnp.sum(jnp.where(cls == lab, s, 0.0), axis=0, keepdims=True)

    per_row = lse - picked                                              # (1, T)
    msk = jnp.where(valid, msk, 0.0)

    # Elementwise accumulation only; cross-lane reduction deferred to epilogue.
    sum_acc[...] += jnp.where(valid, per_row, 0.0) * msk
    cnt_acc[...] += msk

    @pl.when(j == steps - 1)
    def _():
        ones = jnp.ones((1, _LANE), jnp.float32)
        osum_ref[...] = ones * jnp.sum(sum_acc[...])
        ocnt_ref[...] = ones * jnp.sum(cnt_acc[...])


def _choose_tile(n_rows, num_classes, itemsize, *, vmem_budget=6 << 20, cap=16384):
    """Pick the lane tile (rows per grid step): big, 128-aligned, VMEM-safe."""
    c_pad = max(8, -(-num_classes // 8) * 8)          # sublane padding of the scores block
    # double-buffered scores + labels + masks blocks + two f32 accumulators
    per_col = 2 * c_pad * itemsize + 2 * (8 * 4) * 2 + 2 * (8 * 4)
    t = max(_LANE, min(cap, vmem_budget // per_col))
    t -= t % _LANE
    # no point tiling wider than the per-split amount of work
    per_split = -(-n_rows // _NUM_SPLITS)
    t = min(t, -(-per_split // _LANE) * _LANE)
    return max(_LANE, t)


def edge_loss(scores, labels, masks, *, num_classes=None):
    """scores: (..., num_classes); labels: (...,) int; masks: (...,) {0,1}."""
    if num_classes is None:
        num_classes = scores.shape[-1]

    scores_t = scores.reshape(-1, num_classes).T          # (C, N), keep HBM dtype
    labels_r = labels.reshape(1, -1).astype(jnp.int32)    # (1, N)
    masks_r = masks.reshape(1, -1).astype(jnp.float32)    # (1, N)
    n = scores_t.shape[1]

    if n < _LANE:  # need at least one full lane tile; tiny pad, tail masked in-kernel
        pad = _LANE - n
        scores_t = jnp.pad(scores_t, ((0, 0), (0, pad)))
        labels_r = jnp.pad(labels_r, ((0, 0), (0, pad)))
        masks_r = jnp.pad(masks_r, ((0, 0), (0, pad)))

    tile = _choose_tile(n, num_classes, jnp.dtype(scores_t.dtype).itemsize)
    blocks_total = pl.cdiv(max(n, _LANE), tile)
    steps = pl.cdiv(blocks_total, _NUM_SPLITS)
    last_block = blocks_total - 1

    def _in_idx(c, j, n_ref):
        # clamp so DMAs always start in-bounds; duplicated blocks are masked
        # in-kernel via the true row count n.
        return (0, jnp.minimum(c * steps + j, last_block))

    def _out_idx(c, j, n_ref):
        return (0, c)

    n_arr = jnp.array([n], dtype=jnp.int32)

    out_sum, out_cnt = pl.pallas_call(
        _edge_loss_kernel,
        out_shape=(jax.ShapeDtypeStruct((1, _NUM_SPLITS * _LANE), jnp.float32),
                   jax.ShapeDtypeStruct((1, _NUM_SPLITS * _LANE), jnp.float32)),
        grid_spec=pltpu.PrefetchScalarGridSpec(
            num_scalar_prefetch=1,
            grid=(_NUM_SPLITS, steps),
            in_specs=[
                pl.BlockSpec((num_classes, tile), _in_idx),   # scores (C, T)
                pl.BlockSpec((1, tile), _in_idx),             # labels (1, T)
                pl.BlockSpec((1, tile), _in_idx),             # masks  (1, T)
            ],
            out_specs=[
                pl.BlockSpec((1, _LANE), _out_idx),           # per-split loss sum
                pl.BlockSpec((1, _LANE), _out_idx),           # per-split mask count
            ],
            scratch_shapes=[
                pltpu.VMEM((1, tile), jnp.float32),           # masked loss accumulator
                pltpu.VMEM((1, tile), jnp.float32),           # mask count accumulator
            ],
        ),
        compiler_params=pltpu.CompilerParams(
            dimension_semantics=("parallel", "arbitrary")),
    )(n_arr, scores_t, labels_r, masks_r)

    sums = out_sum.reshape(_NUM_SPLITS, _LANE)[:, 0]
    cnts = out_cnt.reshape(_NUM_SPLITS, _LANE)[:, 0]
    # NOTE: if every mask is zero this divides by zero, mirroring the undefined
    # behavior of CrossEntropyLoss on an empty selection.
    return jnp.sum(sums) / jnp.sum(cnts)


def _reference_edge_loss(scores, labels, masks, num_classes):
    s = scores.reshape(-1, num_classes).astype(jnp.float32)
    lab = labels.reshape(-1).astype(jnp.int32)
    m = masks.reshape(-1).astype(jnp.float32)
    lse = jax.scipy.special.logsumexp(s, axis=-1)
    picked = jnp.take_along_axis(s, lab[:, None], axis=-1)[:, 0]
    return jnp.sum((lse - picked) * m) / jnp.sum(m)


if __name__ == "__main__":
    # small shapes implied by the forward: (batch, num_edges, num_classes)
    batch, num_edges, num_classes = 2, 64, 4
    key = jax.random.PRNGKey(0)
    k1, k2, k3 = jax.random.split(key, 3)

    scores = jax.random.normal(k1, (batch, num_edges, num_classes), jnp.float32)
    labels = jax.random.randint(k2, (batch, num_edges), 0, num_classes)
    masks = (jax.random.uniform(k3, (batch, num_edges)) > 0.3).astype(jnp.float32)

    loss_fn = jax.jit(functools.partial(edge_loss, num_classes=num_classes))
    loss = jax.block_until_ready(loss_fn(scores, labels, masks))

    ref = _reference_edge_loss(scores, labels, masks, num_classes)
    assert jnp.allclose(loss, ref, atol=1e-5, rtol=1e-5), (loss, ref)

    print("KERNEL_OK")
</pallas_src>

<mosaic_0001>
module attributes {stable_mosaic.version = 11 : i64} {
  func.func @_edge_loss_kernel(%arg0: i32, %arg1: i32, %arg2: memref<1xi32, #tpu.memory_space<smem>>, %arg3: memref<4x128xf32, #tpu.memory_space<vmem>>, %arg4: memref<1x128xi32, #tpu.memory_space<vmem>>, %arg5: memref<1x128xf32, #tpu.memory_space<vmem>>, %arg6: memref<1x128xf32, #tpu.memory_space<vmem>>, %arg7: memref<1x128xf32, #tpu.memory_space<vmem>>, %arg8: memref<1x128xf32, #tpu.memory_space<vmem>>, %arg9: memref<1x128xf32, #tpu.memory_space<vmem>>) attributes {dimension_semantics = [#tpu.dimension_semantics<parallel>, #tpu.dimension_semantics<arbitrary>], iteration_bounds = array<i64: 2, 1>, scalar_prefetch = 1 : i64, scratch_operands = 2 : i64, tpu.core_type = #tpu.core_type<tc>, window_params = [{transform_indices = @transform_0, window_bounds = array<i64: 4, 128>}, {transform_indices = @transform_1, window_bounds = array<i64: 1, 128>}, {transform_indices = @transform_2, window_bounds = array<i64: 1, 128>}, {transform_indices = @transform_3, window_bounds = array<i64: 1, 128>}, {transform_indices = @transform_4, window_bounds = array<i64: 1, 128>}]} {
    %c0_i32 = arith.constant 0 : i32
    %0 = arith.cmpi eq, %arg1, %c0_i32 : i32
    %1 = arith.extui %0 : i1 to i32
    %c0_i32_0 = arith.constant 0 : i32
    %2 = arith.cmpi ne, %1, %c0_i32_0 : i32
    scf.if %2 {
      %cst_22 = arith.constant 0.000000e+00 : f32
      %46 = vector.broadcast %cst_22 : f32 to vector<1x128xf32>
      %c0_23 = arith.constant 0 : index
      %c0_24 = arith.constant 0 : index
      %47 = vector.load %arg8[%c0_23, %c0_24] : memref<1x128xf32, #tpu.memory_space<vmem>>, vector<1x128xf32>
      tpu.vector_store %arg8[%c0_23, %c0_24], %46 {strides = array<i32>} : memref<1x128xf32, #tpu.memory_space<vmem>>, vector<1x128xf32>,
      %cst_25 = arith.constant 0.000000e+00 : f32
      %48 = vector.broadcast %cst_25 : f32 to vector<1x128xf32>
      %c0_26 = arith.constant 0 : index
      %c0_27 = arith.constant 0 : index
      %49 = vector.load %arg9[%c0_26, %c0_27] : memref<1x128xf32, #tpu.memory_space<vmem>>, vector<1x128xf32>
      tpu.vector_store %arg9[%c0_26, %c0_27], %48 {strides = array<i32>} : memref<1x128xf32, #tpu.memory_space<vmem>>, vector<1x128xf32>,
    } else {
    }
    %c0 = arith.constant 0 : index
    %c0_1 = arith.constant 0 : index
    %3 = vector.load %arg3[%c0, %c0_1] : memref<4x128xf32, #tpu.memory_space<vmem>>, vector<4x128xf32>
    %c0_2 = arith.constant 0 : index
    %c0_3 = arith.constant 0 : index
    %4 = vector.load %arg4[%c0_2, %c0_3] : memref<1x128xi32, #tpu.memory_space<vmem>>, vector<1x128xi32>
    %c0_4 = arith.constant 0 : index
    %c0_5 = arith.constant 0 : index
    %5 = vector.load %arg5[%c0_4, %c0_5] : memref<1x128xf32, #tpu.memory_space<vmem>>, vector<1x128xf32>
    %c1_i32 = arith.constant 1 : i32
    %6 = arith.muli %arg0, %c1_i32 : i32
    %7 = arith.addi %6, %arg1 : i32
    %c128_i32 = arith.constant 128 : i32
    %8 = arith.muli %7, %c128_i32 : i32
    %9 = tpu.iota {dimensions = array<i32: 1>} : vector<1x128xi32>
    %10 = vector.broadcast %8 : i32 to vector<1x128xi32>
    %11 = arith.addi %10, %9 : vector<1x128xi32>
    %c0_6 = arith.constant 0 : index
    %12 = memref.load %arg2[%c0_6] : memref<1xi32, #tpu.memory_space<smem>>
    %13 = vector.broadcast %12 : i32 to vector<1x128xi32>
    %14 = arith.cmpi slt, %11, %13 : vector<1x128xi32>
    %cst = arith.constant dense<0xFF800000> : vector<128xf32>
    %15 = vector.multi_reduction <maximumf>, %3, %cst [0] : vector<4x128xf32> to vector<128xf32>
    %16 = vector.shape_cast %15 : vector<128xf32> to vector<1x128xf32>
    %17 = vector.broadcast %16 : vector<1x128xf32> to vector<4x128xf32>
    %18 = arith.subf %3, %17 : vector<4x128xf32>
    %19 = math.exp %18 : vector<4x128xf32>
    %cst_7 = arith.constant dense<0.000000e+00> : vector<128xf32>
    %20 = vector.multi_reduction <add>, %19, %cst_7 [0] : vector<4x128xf32> to vector<128xf32>
    %21 = vector.shape_cast %20 : vector<128xf32> to vector<1x128xf32>
    %22 = math.log %21 : vector<1x128xf32>
    %23 = arith.addf %16, %22 : vector<1x128xf32>
    %24 = tpu.iota {dimensions = array<i32: 0>} : vector<4x128xi32>
    %25 = vector.broadcast %4 : vector<1x128xi32> to vector<4x128xi32>
    %26 = arith.cmpi eq, %24, %25 : vector<4x128xi32>
    %cst_8 = arith.constant 0.000000e+00 : f32
    %27 = vector.broadcast %cst_8 : f32 to vector<4x128xf32>
    %28 = arith.select %26, %3, %27 : vector<4x128xi1>, vector<4x128xf32>
    %cst_9 = arith.constant dense<0.000000e+00> : vector<128xf32>
    %29 = vector.multi_reduction <add>, %28, %cst_9 [0] : vector<4x128xf32> to vector<128xf32>
    %30 = vector.shape_cast %29 : vector<128xf32> to vector<1x128xf32>
    %31 = arith.subf %23, %30 : vector<1x128xf32>
    %cst_10 = arith.constant 0.000000e+00 : f32
    %32 = vector.broadcast %cst_10 : f32 to vector<1x128xf32>
    %33 = arith.select %14, %5, %32 : vector<1x128xi1>, vector<1x128xf32>
    %c0_11 = arith.constant 0 : index
    %c0_12 = arith.constant 0 : index
    %34 = vector.load %arg8[%c0_11, %c0_12] : memref<1x128xf32, #tpu.memory_space<vmem>>, vector<1x128xf32>
    %cst_13 = arith.constant 0.000000e+00 : f32
    %35 = vector.broadcast %cst_13 : f32 to vector<1x128xf32>
    %36 = arith.select %14, %31, %35 : vector<1x128xi1>, vector<1x128xf32>
    %37 = arith.mulf %36, %33 : vector<1x128xf32>
    %38 = arith.addf %34, %37 : vector<1x128xf32>
    %c0_14 = arith.constant 0 : index
    %c0_15 = arith.constant 0 : index
    %39 = vector.load %arg8[%c0_14, %c0_15] : memref<1x128xf32, #tpu.memory_space<vmem>>, vector<1x128xf32>
    tpu.vector_store %arg8[%c0_14, %c0_15], %38 {strides = array<i32>} : memref<1x128xf32, #tpu.memory_space<vmem>>, vector<1x128xf32>,
    %c0_16 = arith.constant 0 : index
    %c0_17 = arith.constant 0 : index
    %40 = vector.load %arg9[%c0_16, %c0_17] : memref<1x128xf32, #tpu.memory_space<vmem>>, vector<1x128xf32>
    %41 = arith.addf %40, %33 : vector<1x128xf32>
    %c0_18 = arith.constant 0 : index
    %c0_19 = arith.constant 0 : index
    %42 = vector.load %arg9[%c0_18, %c0_19] : memref<1x128xf32, #tpu.memory_space<vmem>>, vector<1x128xf32>
    tpu.vector_store %arg9[%c0_18, %c0_19], %41 {strides = array<i32>} : memref<1x128xf32, #tpu.memory_space<vmem>>, vector<1x128xf32>,
    %c0_i32_20 = arith.constant 0 : i32
    %43 = arith.cmpi eq, %arg1, %c0_i32_20 : i32
    %44 = arith.extui %43 : i1 to i32
    %c0_i32_21 = arith.constant 0 : i32
    %45 = arith.cmpi ne, %44, %c0_i32_21 : i32
    scf.if %45 {
      %cst_22 = arith.constant 1.000000e+00 : f32
      %46 = vector.broadcast %cst_22 : f32 to vector<1x128xf32>
      %c0_23 = arith.constant 0 : index
      %c0_24 = arith.constant 0 : index
      %47 = vector.load %arg8[%c0_23, %c0_24] : memref<1x128xf32, #tpu.memory_space<vmem>>, vector<1x128xf32>
      %48 = vector.shape_cast %47 : vector<1x128xf32> to vector<1x1x128xf32>
      %cst_25 = arith.constant dense<0.000000e+00> : vector<1xf32>
      %49 = vector.multi_reduction <add>, %48, %cst_25 [1, 2] : vector<1x1x128xf32> to vector<1xf32>
      %50 = vector.shape_cast %49 : vector<1xf32> to vector<1x1x1xf32>
      %51 = vector.extract %50[0, 0, 0] : f32 from vector<1x1x1xf32>
      %52 = vector.broadcast %51 : f32 to vector<1x128xf32>
      %53 = arith.mulf %46, %52 : vector<1x128xf32>
      %c0_26 = arith.constant 0 : index
      %c0_27 = arith.constant 0 : index
      %54 = vector.load %arg6[%c0_26, %c0_27] : memref<1x128xf32, #tpu.memory_space<vmem>>, vector<1x128xf32>
      tpu.vector_store %arg6[%c0_26, %c0_27], %53 {strides = array<i32>} : memref<1x128xf32, #tpu.memory_space<vmem>>, vector<1x128xf32>,
      %c0_28 = arith.constant 0 : index
      %c0_29 = arith.constant 0 : index
      %55 = vector.load %arg9[%c0_28, %c0_29] : memref<1x128xf32, #tpu.memory_space<vmem>>, vector<1x128xf32>
      %56 = vector.shape_cast %55 : vector<1x128xf32> to vector<1x1x128xf32>
      %cst_30 = arith.constant dense<0.000000e+00> : vector<1xf32>
      %57 = vector.multi_reduction <add>, %56, %cst_30 [1, 2] : vector<1x1x128xf32> to vector<1xf32>
      %58 = vector.shape_cast %57 : vector<1xf32> to vector<1x1x1xf32>
      %59 = vector.extract %58[0, 0, 0] : f32 from vector<1x1x1xf32>
      %60 = vector.broadcast %59 : f32 to vector<1x128xf32>
      %61 = arith.mulf %46, %60 : vector<1x128xf32>
      %c0_31 = arith.constant 0 : index
      %c0_32 = arith.constant 0 : index
      %62 = vector.load %arg7[%c0_31, %c0_32] : memref<1x128xf32, #tpu.memory_space<vmem>>, vector<1x128xf32>
      tpu.vector_store %arg7[%c0_31, %c0_32], %61 {strides = array<i32>} : memref<1x128xf32, #tpu.memory_space<vmem>>, vector<1x128xf32>,
    } else {
    }
    return
  }
  func.func @transform_0(%arg0: i32, %arg1: i32, %arg2: memref<1xi32, #tpu.memory_space<smem>>) -> (i32, i32) {
    %c1_i32 = arith.constant 1 : i32
    %0 = arith.muli %arg0, %c1_i32 : i32
    %1 = arith.addi %0, %arg1 : i32
    %c0_i32 = arith.constant 0 : i32
    %2 = arith.minsi %1, %c0_i32 : i32
    %c0_i32_0 = arith.constant 0 : i32
    %c0_i32_1 = arith.constant 0 : i32
    return %c0_i32_0, %2 : i32, i32
  }
  func.func @transform_1(%arg0: i32, %arg1: i32, %arg2: memref<1xi32, #tpu.memory_space<smem>>) -> (i32, i32) {
    %c1_i32 = arith.constant 1 : i32
    %0 = arith.muli %arg0, %c1_i32 : i32
    %1 = arith.addi %0, %arg1 : i32
    %c0_i32 = arith.constant 0 : i32
    %2 = arith.minsi %1, %c0_i32 : i32
    %c0_i32_0 = arith.constant 0 : i32
    %c0_i32_1 = arith.constant 0 : i32
    return %c0_i32_0, %2 : i32, i32
  }
  func.func @transform_2(%arg0: i32, %arg1: i32, %arg2: memref<1xi32, #tpu.memory_space<smem>>) -> (i32, i32) {
    %c1_i32 = arith.constant 1 : i32
    %0 = arith.muli %arg0, %c1_i32 : i32
    %1 = arith.addi %0, %arg1 : i32
    %c0_i32 = arith.constant 0 : i32
    %2 = arith.minsi %1, %c0_i32 : i32
    %c0_i32_0 = arith.constant 0 : i32
    %c0_i32_1 = arith.constant 0 : i32
    return %c0_i32_0, %2 : i32, i32
  }
  func.func @transform_3(%arg0: i32, %arg1: i32, %arg2: memref<1xi32, #tpu.memory_space<smem>>) -> (i32, i32) {
    %c0_i32 = arith.constant 0 : i32
    %c0_i32_0 = arith.constant 0 : i32
    return %c0_i32, %arg0 : i32, i32
  }
  func.func @transform_4(%arg0: i32, %arg1: i32, %arg2: memref<1xi32, #tpu.memory_space<smem>>) -> (i32, i32) {
    %c0_i32 = arith.constant 0 : i32
    %c0_i32_0 = arith.constant 0 : i32
    return %c0_i32, %arg0 : i32, i32
  }
}

</mosaic_0001>

<bundles_post_ra>
// kernel: edge_loss.1
= control target key start
LH: loop header
LB: loop body
LE: loop exit
PB: predicated region body
PF: predicated region fallthrough
CT: control target
= control target key end

     0   :  { %s607_s20 = smov 0   ;;  %s609_s21 = smov 0   ;;  %s667_s0 = inlined_call_operand.<no memory space> [shape: s32[1], index: 0, kind: input, shape index: {}]   ;;  %s668_s1 = inlined_call_operand.vmem [shape: f32[4,128], index: 1, kind: input, shape index: {}]   ;;  %s669_s2 = inlined_call_operand.vmem [shape: s32[1,128], index: 2, kind: input, shape index: {}]   ;;  %s670_s3 = inlined_call_operand.vmem [shape: f32[1,128], index: 3, kind: input, shape index: {}]   ;;  %s671_s4 = inlined_call_operand.vmem [shape: f32[1,256], index: 4, kind: output, shape index: {0}]   ;;  %s672_s5 = inlined_call_operand.vmem [shape: f32[1,256], index: 5, kind: output, shape index: {1}]  }
   0x1   :  { %11 = sst [smem:[#allocation5]] %s667_s0  ;;  %s611_s22 = smov 0  }
   0x2 LB: > { %s29_s0 = sadd.s32 1, %s567_s21  ;;  %p501_p0 = scmp.ge.s32.totalorder %s571_s22, 1  ;;  %s571_s22 = sphi %s611_s22, %s17_s22   ;;  %s567_s21 = sphi %s609_s21, %s676_s21   ;;  %s563_s20 = sphi %s607_s20, %s675_s20  }
   0x3   : > { %p31_p1 = scmp.ge.s32.totalorder %s29_s0, 2  ;;  %p230_p2 = scmp.lt.s32.totalorder %s571_s22, 3 }
   0x5   : > { %s678_s0 = smov (%p31_p1, %s29_s0), 0  ;;  %p231_p3 = pnand %p501_p0, %p230_p2 }
   0x6   : > { %p272_p4 = scmp.lt.s32.totalorder (!%p231_p3), %s563_s20, 0  ;;  %s512_s23 = sshll.u32 (!%p231_p3), %s563_s20, 7  ;;  %v316_v0 = vlaneseq (!%p231_p3)  ;;  %v573_v1 = vmov (!%p231_p3), 0.0   ;;  %vm323_vm0 = vcmask (!%p231_p3), 1043456   ;;  %vm373_vm3 = vcmask (!%p231_p3), 1040384  }
   0x7   : > { %234 = sbr.rel (%p231_p3) target bundleno = 302 (0x12e), region = 32  ;;  %309 = vst [vmem:[#allocation2] sm:$0x1] (!%p231_p3), %v573_v1  ;;  %v318_v2 = vstv (!%p231_p3), %s512_s23  ;;  %s320_s24 = sld [smem:[#allocation5]] (!%p231_p3)  ;;  %310 = vst [vmem:[#allocation3] sm:$0x1] (!%p231_p3), %v573_v1 }
   0x8   : > { %v317_v3 = vand.u32 (!%p231_p3), 127, %v316_v0  ;;  %v345_v21 = vshrl.u32 (!%p231_p3), %v316_v0, 7  ;;  %p299_p5 = scmp.lt.s32.totalorder (!%p231_p3), %s563_s20, 1 }
   0xa   : > { %v319_v4 = vadd.s32 (!%p231_p3), %v318_v2, %v317_v3 }
   0xd   : > { %v321_v5 = vstv (!%p231_p3), %s320_s24 }
   0xe   : > { %s273_s25 = scalar_select %p272_p4, %s563_s20, 0  ;;  %vm636_vm1 = vcmp.lt.s32.totalorder %v319_v4, %v321_v5  ;;  %v366_v11 = vld [vmem:[#allocation3] sm:$0x1]  ;;  %v361_v43 = vld [vmem:[#allocation2] sm:$0x1] }
   0xf   : > { %s682_s20 = smov (!%p299_p5, %s563_s20), 1 }
  0x10   : > { %s680_s25 = smov (!%p272_p4, %s273_s25), 0  ;;  %s301_s13 = scalar_lea.vmem %s671_s4, %s682_s20 }
  0x11   : > { %s505_s26 = sshll.u32 %s680_s25, 2  ;;  %s295_s7 = scalar_lea.vmem %s670_s3, %s680_s25 }
  0x12   : > { %s277_s29 = scalar_lea.vmem %s668_s1, %s505_s26  ;;  %v313_v7 = vld [vmem:[%s295_s7] sm:$0x1]  ;;  %s286_s10 = scalar_lea.vmem %s669_s2, %s680_s25 }
  0x13   : > { %v311_v6 = vld [vmem:[%s277_s29] sm:$0xf]  ;;  %v360_v10 = vsel %vm636_vm1, %v313_v7, 0.0  ;;  %s304_s17 = scalar_lea.vmem %s672_s5, %s682_s20 }
  0x14   : > { %v324_v9 = vsel %vm323_vm0, %v311_v6, -inf  ;;  %v367_v13 = vadd.f32 %v366_v11, %v360_v10  ;;  %v513_v22 = vld [vmem:[%s286_s10] ss:$0 sm:$0xff] }
  0x15   : > { %v325_v12 = vrot.slane %v324_v9, 4  ;;  %vm350_vm2 = vcmp.eq.s32.totalorder %v345_v21, %v513_v22 }
  0x16   : > { %368 = vst [vmem:[#allocation3] sm:$0x1] %v367_v13  ;;  %v351_v23 = vsel %vm350_vm2, %v311_v6, 0.0 }
  0x17   : > { %v326_v14 = vmax.f32 %v324_v9, %v325_v12  ;;  %v352_v27 = vsel %vm323_vm0, %v351_v23, 0.0 }
  0x18   : > { %v353_v29 = vrot.slane %v352_v27, 4 }
  0x19   : > { %v327_v15 = vrot.slane %v326_v14, 2 }
  0x1a   : > { %v354_v32 = vadd.f32 %v353_v29, %v352_v27 }
  0x1b   : > { %v328_v16 = vmax.f32 %v326_v14, %v327_v15 }
  0x1c   : > { %v355_v35 = vrot.slane %v354_v32, 2 }
  0x1d   : > { %v329_v17 = vrot.slane %v328_v16, 1  ;;  %v386_v48 = vld [vmem:[#allocation3] sm:$0x1] }
  0x1e   : > { %v356_v36 = vadd.f32 %v355_v35, %v354_v32  ;;  %v387_v50 = vsel %vm373_vm3, %v386_v48, 0.0 }
  0x1f   : > { %v330_v18 = vmax.f32 %v328_v16, %v329_v17 }
  0x20   : > { %v357_v37 = vrot.slane %v356_v36, 1 }
  0x21   : > { %v331_v19 = vsub.f32 %v311_v6, %v330_v18 }
  0x22   : > { %v358_v40 = vadd.f32 %v357_v37, %v356_v36 }
  0x23   : > { %v332_v20 = vmul.f32 1.442695, %v331_v19 }
  0x25   : > { %545 = vpow2.f32 %v332_v20 }
  0x2f   : > { %v546_v24 = vpop.eup %545 }
  0x30   : > { %v334_v25 = vsel %vm323_vm0, %v546_v24, 0.0 }
  0x31   : > { %v335_v26 = vrot.slane %v334_v25, 4 }
  0x33   : > { %v336_v28 = vadd.f32 %v335_v26, %v334_v25 }
  0x35   : > { %v337_v30 = vrot.slane %v336_v28, 2 }
  0x37   : > { %v338_v31 = vadd.f32 %v337_v30, %v336_v28 }
  0x39   : > { %v339_v33 = vrot.slane %v338_v31, 1 }
  0x3b   : > { %v340_v34 = vadd.f32 %v339_v33, %v338_v31 }
  0x3d   : > { %547 = vlog2.f32 %v340_v34 }
  0x47   : > { %v548_v38 = vpop.eup %547 }
  0x48   : > { %v342_v39 = vmul.f32 0.6931472, %v548_v38 }
  0x4a   : > { %v343_v41 = vadd.f32 %v342_v39, %v330_v18 }
  0x4c   : > { %v359_v42 = vsub.f32 %v343_v41, %v358_v40 }
  0x4e   : > { %v362_v44 = vsel %vm636_vm1, %v359_v42, 0.0 }
  0x4f   : > { %v363_v45 = vmul.f32 %v362_v44, %v360_v10 }
  0x51   : > { %v364_v46 = vadd.f32 %v363_v45, %v361_v43 }
  0x53   : > { %365 = vst [vmem:[#allocation2] sm:$0x1] %v364_v46 }
  0x5a   : > { %v372_v47 = vld [vmem:[#allocation2] sm:$0x1] }
  0x5b   : > { %v374_v49 = vsel %vm373_vm3, %v372_v47, 0.0 }
  0x5c   : > { %375 = vadd.xlane.f32.xlu0 %v374_v49 }
  0x60   : > { %388 = vadd.xlane.f32.xlu0 %v387_v50 }
  0xe9   : > { %v376_v51 = vpop.xlane.xlu0 %375 }
  0xea   : > { %v377_v52 = vrot.slane %v376_v51, 4 }
  0xec   : > { %v378_v53 = vadd.f32 %v377_v52, %v376_v51 }
  0xed   : > { %v389_v54 = vpop.xlane.xlu0 %388 }
  0xee   : > { %v379_v55 = vrot.slane %v378_v53, 2  ;;  %v390_v56 = vrot.slane %v389_v54, 4 }
  0xf0   : > { %v391_v57 = vadd.f32 %v390_v56, %v389_v54  ;;  %v380_v58 = vadd.f32 %v379_v55, %v378_v53 }
  0xf2   : > { %v392_v59 = vrot.slane %v391_v57, 2  ;;  %v381_v60 = vrot.slane %v380_v58, 1 }
  0xf4   : > { %v393_v61 = vadd.f32 %v392_v59, %v391_v57  ;;  %v382_v62 = vadd.f32 %v381_v60, %v380_v58 }
  0xf6   : > { %516 = vpush %v382_v62  ;;  %v394_v63 = vrot.slane %v393_v61, 1 }
  0xf8   : > { %v395_v0 = vadd.f32 %v394_v63, %v393_v61 }
  0xfa   : > { %518 = vpush %v395_v0 }
 0x127   : > { %s517_s14 = spop %516 }
 0x128   : > { %v384_v1 = vstv %s517_s14 }
 0x129   : > { %385 = vst [vmem:[%s301_s13] sm:$0x1] %v384_v1 }
 0x12b   : > { %s519_s18 = spop %518 }
 0x12c   : > { %v397_v2 = vstv %s519_s18 }
 0x12d   : > { %398 = vst [vmem:[%s304_s17] sm:$0x1] %v397_v2 }
 0x12e PF: > { %s17_s22 = sadd.s32 1, %s571_s22   ;;  %s675_s20 = smov %s567_s21 }
 0x12f   : > { %p14_p6 = scmp.ge.s32.totalorder %s17_s22, 4   ;;  %s676_s21 = smov %s678_s0 }
 0x131   :  { %16 = sbr.rel (!%p14_p6) target bundleno = 2 (0x2), region = 88 }

</bundles_post_ra>
